<compile_context>
chip_gen: v6e
topology: v6e:2x2x1
jax: 0.10.0
libtpu: 0.0.40
codegen_flags: <defaults>
</compile_context>

<pallas_src>
import math
import functools

import jax
import jax.numpy as jnp
import numpy as np
from jax.experimental import pallas as pl
from jax.experimental.pallas import tpu as pltpu  # noqa: F401  (TPU backend)

# ---- model hyperparameters (small, consistent with the module) -------------
NUM_HEADS = 4
D_MODEL = 32
D_FF = 64
BATCH = 2
SEQ = 8
LN_EPS = 1e-5  # torch.nn.LayerNorm default


def _layernorm(v, gamma, beta):
    mean = jnp.mean(v, axis=-1, keepdims=True)
    var = jnp.mean((v - mean) ** 2, axis=-1, keepdims=True)
    return (v - mean) * jax.lax.rsqrt(var + LN_EPS) * gamma + beta


def gpt_decoder_kernel(
    x_ref, mask_ref,
    wqkv_ref, bqkv_ref, wo_ref, bo_ref,
    g1_ref, be1_ref,
    w1_ref, b1_ref, w2_ref, b2_ref,
    g2_ref, be2_ref,
    o_ref,
    *, num_heads,
):
    x = x_ref[...].astype(jnp.float32)                     # (B*S, D)
    n_rows, d_model = x.shape
    d_k = d_model // num_heads

    # --- fused QKV projection: one MXU push, N = 3*D lanes.
    # 1/sqrt(d_k) is already folded into the Q block of wqkv/bqkv (wrapper).
    qkv = jnp.dot(x, wqkv_ref[...], preferred_element_type=jnp.float32) + bqkv_ref[...]
    q = qkv[:, :d_model]
    k = qkv[:, d_model:2 * d_model]
    v = qkv[:, 2 * d_model:]

    # --- precomputed additive block-diagonal causal mask (0 / -1e9) ---
    mask_bias = mask_ref[...]                               # (B*S, B*S)

    # --- multi-head attention, Wo folded into the head loop (no lane concat) ---
    attn = jnp.zeros((n_rows, d_model), jnp.float32)
    for h in range(num_heads):             # static loop over heads
        sl = slice(h * d_k, (h + 1) * d_k)
        qh, kh, vh = q[:, sl], k[:, sl], v[:, sl]
        s = jax.lax.dot_general(qh, kh, (((1,), (1,)), ((), ())),
                                preferred_element_type=jnp.float32)  # (BS, BS)
        s = s + mask_bias
        m = jnp.max(s, axis=-1, keepdims=True)
        p = jnp.exp(s - m)
        denom = jnp.sum(p, axis=-1, keepdims=True)
        p = p / denom                       # exact division (tolerance safety)
        attn_h = jnp.dot(p, vh, preferred_element_type=jnp.float32)   # (BS, d_k)
        # wo row-slice start is a multiple of d_k=8 -> sublane-aligned, free.
        attn = attn + jnp.dot(attn_h, wo_ref[h * d_k:(h + 1) * d_k, :],
                              preferred_element_type=jnp.float32)
    attn = attn + bo_ref[...]

    # --- residual + LayerNorm 1 ---
    h1 = _layernorm(x + attn, g1_ref[...], be1_ref[...])

    # --- feed-forward ---
    ff = jnp.maximum(
        jnp.dot(h1, w1_ref[...], preferred_element_type=jnp.float32) + b1_ref[...], 0.0)
    ff = jnp.dot(ff, w2_ref[...], preferred_element_type=jnp.float32) + b2_ref[...]

    # --- residual + LayerNorm 2 ---
    h2 = _layernorm(h1 + ff, g2_ref[...], be2_ref[...])
    o_ref[...] = h2.astype(o_ref.dtype)


@jax.jit
def gpt_decoder_pallas(x, params):
    """x: (B, S, D) float32.  params: flat list of weights (see init_params)."""
    (wq, bq, wk, bk, wv, bv, wo, bo,
     g1, be1, w1, b1, w2, b2, g2, be2) = params
    B, S, D = x.shape
    d_k = D // NUM_HEADS
    scale = 1.0 / math.sqrt(d_k)

    # Fuse QKV weights/bias in the wrapper, folding the 1/sqrt(d_k) scale into
    # the Q block (trace-time constant work, zero in-kernel cost).
    wqkv = jnp.concatenate([wq * scale, wk, wv], axis=1)   # (D, 3D)
    bqkv = jnp.concatenate([bq * scale, bk, bv], axis=1)   # (1, 3D)
    x2d = x.reshape(B * S, D)                               # flatten batch into rows

    # Precompute the block-diagonal (same-batch) causal mask as an additive
    # 0 / -1e9 bias.  Fully static: built with numpy at trace time.
    n_rows = B * S
    r = np.arange(n_rows)
    allowed = (r[:, None] // S == r[None, :] // S) & (r[None, :] <= r[:, None])
    mask_bias = jnp.asarray(np.where(allowed, 0.0, -1e9).astype(np.float32))

    kernel = functools.partial(gpt_decoder_kernel, num_heads=NUM_HEADS)
    out2d = pl.pallas_call(
        kernel,
        out_shape=jax.ShapeDtypeStruct((B * S, D), jnp.float32),
        # No grid: single invocation; all inputs are whole-array VMEM blocks,
        # so the ~25 KB of small tensors are not re-DMA'd or double-buffered.
    )(x2d, mask_bias, wqkv, bqkv, wo, bo, g1, be1, w1, b1, w2, b2, g2, be2)
    return out2d.reshape(B, S, D)


def init_params(key):
    """Deterministic synthetic parameters. Linear weights stored as (in, out)."""
    ks = jax.random.split(key, 12)
    f = jnp.float32

    def w(k, shape, scale=0.05):
        return jax.random.normal(k, shape, dtype=f) * scale

    wq = w(ks[0], (D_MODEL, D_MODEL)); bq = w(ks[1], (1, D_MODEL))
    wk = w(ks[2], (D_MODEL, D_MODEL)); bk = w(ks[3], (1, D_MODEL))
    wv = w(ks[4], (D_MODEL, D_MODEL)); bv = w(ks[5], (1, D_MODEL))
    wo = w(ks[6], (D_MODEL, D_MODEL)); bo = w(ks[7], (1, D_MODEL))
    g1 = jnp.ones((1, D_MODEL), f);    be1 = jnp.zeros((1, D_MODEL), f)
    w1 = w(ks[8], (D_MODEL, D_FF));    b1 = w(ks[9], (1, D_FF))
    w2 = w(ks[10], (D_FF, D_MODEL));   b2 = w(ks[11], (1, D_MODEL))
    g2 = jnp.ones((1, D_MODEL), f);    be2 = jnp.zeros((1, D_MODEL), f)
    return [wq, bq, wk, bk, wv, bv, wo, bo, g1, be1, w1, b1, w2, b2, g2, be2]


def gpt_decoder_reference(x, params):
    """Pure-JAX reference matching the PyTorch forward exactly."""
    (wq, bq, wk, bk, wv, bv, wo, bo, g1, be1, w1, b1, w2, b2, g2, be2) = params
    B, S, D = x.shape
    d_k = D // NUM_HEADS

    def split_heads(t):  # (B,S,D) -> (B,H,S,dk)
        return t.reshape(B, S, NUM_HEADS, d_k).transpose(0, 2, 1, 3)

    Q = split_heads(x @ wq + bq)
    K = split_heads(x @ wk + bk)
    V = split_heads(x @ wv + bv)
    scores = jnp.einsum("bhqd,bhkd->bhqk", Q, K) / math.sqrt(d_k)
    mask = jnp.tril(jnp.ones((S, S), jnp.float32))[None, None]
    scores = jnp.where(mask == 0, -1e9, scores)
    attn_w = jax.nn.softmax(scores, axis=-1)
    attn = jnp.einsum("bhqk,bhkd->bhqd", attn_w, V)
    attn = attn.transpose(0, 2, 1, 3).reshape(B, S, D)
    attn = attn @ wo + bo

    h1 = _layernorm(x + attn, g1, be1)
    ff = jnp.maximum(h1 @ w1 + b1, 0.0) @ w2 + b2
    return _layernorm(h1 + ff, g2, be2)


if __name__ == "__main__":
    key = jax.random.PRNGKey(0)
    kx, kp = jax.random.split(key)
    x = jax.random.normal(kx, (BATCH, SEQ, D_MODEL), dtype=jnp.float32)
    params = init_params(kp)

    out = gpt_decoder_pallas(x, params)
    out = jax.block_until_ready(out)

    ref = gpt_decoder_reference(x, params)
    np.testing.assert_allclose(np.asarray(out), np.asarray(ref),
                               atol=2e-4, rtol=2e-4)

    print("KERNEL_OK")
</pallas_src>

<mosaic_0001>
module attributes {stable_mosaic.version = 11 : i64} {
  func.func @gpt_decoder_kernel(%arg0: memref<16x32xf32, #tpu.memory_space<vmem>>, %arg1: memref<16x16xf32, #tpu.memory_space<vmem>>, %arg2: memref<32x96xf32, #tpu.memory_space<vmem>>, %arg3: memref<1x96xf32, #tpu.memory_space<vmem>>, %arg4: memref<32x32xf32, #tpu.memory_space<vmem>>, %arg5: memref<1x32xf32, #tpu.memory_space<vmem>>, %arg6: memref<1x32xf32, #tpu.memory_space<vmem>>, %arg7: memref<1x32xf32, #tpu.memory_space<vmem>>, %arg8: memref<32x64xf32, #tpu.memory_space<vmem>>, %arg9: memref<1x64xf32, #tpu.memory_space<vmem>>, %arg10: memref<64x32xf32, #tpu.memory_space<vmem>>, %arg11: memref<1x32xf32, #tpu.memory_space<vmem>>, %arg12: memref<1x32xf32, #tpu.memory_space<vmem>>, %arg13: memref<1x32xf32, #tpu.memory_space<vmem>>, %arg14: memref<16x32xf32, #tpu.memory_space<vmem>>) attributes {dimension_semantics = [], scalar_prefetch = 0 : i64, scratch_operands = 0 : i64, tpu.core_type = #tpu.core_type<tc>} {
    %c0 = arith.constant 0 : index
    %c0_0 = arith.constant 0 : index
    %0 = vector.load %arg0[%c0, %c0_0] : memref<16x32xf32, #tpu.memory_space<vmem>>, vector<16x32xf32>
    %c0_1 = arith.constant 0 : index
    %c0_2 = arith.constant 0 : index
    %1 = vector.load %arg2[%c0_1, %c0_2] : memref<32x96xf32, #tpu.memory_space<vmem>>, vector<32x96xf32>
    %cst = arith.constant dense<0.000000e+00> : vector<16x96xf32>
    %2 = tpu.matmul %0, %1, %cst {dimension_numbers = #tpu.dot_dimension_numbers<[1], [0], [0], [1], [0, 0, 1, 1], [], []>} : vector<16x32xf32>, vector<32x96xf32>, vector<16x96xf32> -> vector<16x96xf32>
    %c0_3 = arith.constant 0 : index
    %c0_4 = arith.constant 0 : index
    %3 = vector.load %arg3[%c0_3, %c0_4] : memref<1x96xf32, #tpu.memory_space<vmem>>, vector<1x96xf32>
    %4 = vector.broadcast %3 : vector<1x96xf32> to vector<16x96xf32>
    %5 = arith.addf %2, %4 : vector<16x96xf32>
    %6 = vector.extract_strided_slice %5 {offsets = [0, 0], sizes = [16, 32], strides = [1, 1]} : vector<16x96xf32> to vector<16x32xf32>
    %7 = vector.extract_strided_slice %5 {offsets = [0, 32], sizes = [16, 32], strides = [1, 1]} : vector<16x96xf32> to vector<16x32xf32>
    %8 = vector.extract_strided_slice %5 {offsets = [0, 64], sizes = [16, 32], strides = [1, 1]} : vector<16x96xf32> to vector<16x32xf32>
    %c0_5 = arith.constant 0 : index
    %c0_6 = arith.constant 0 : index
    %9 = vector.load %arg1[%c0_5, %c0_6] : memref<16x16xf32, #tpu.memory_space<vmem>>, vector<16x16xf32>
    %cst_7 = arith.constant 0.000000e+00 : f32
    %10 = vector.broadcast %cst_7 : f32 to vector<16x32xf32>
    %11 = vector.extract_strided_slice %6 {offsets = [0, 0], sizes = [16, 8], strides = [1, 1]} : vector<16x32xf32> to vector<16x8xf32>
    %12 = vector.extract_strided_slice %7 {offsets = [0, 0], sizes = [16, 8], strides = [1, 1]} : vector<16x32xf32> to vector<16x8xf32>
    %13 = vector.extract_strided_slice %8 {offsets = [0, 0], sizes = [16, 8], strides = [1, 1]} : vector<16x32xf32> to vector<16x8xf32>
    %cst_8 = arith.constant dense<0.000000e+00> : vector<16x16xf32>
    %14 = tpu.matmul %11, %12, %cst_8 {dimension_numbers = #tpu.dot_dimension_numbers<[1], [1], [0], [0], [0, 0, 1, 0], [], []>} : vector<16x8xf32>, vector<16x8xf32>, vector<16x16xf32> -> vector<16x16xf32>
    %15 = arith.addf %14, %9 : vector<16x16xf32>
    %cst_9 = arith.constant dense<0xFF800000> : vector<16xf32>
    %16 = vector.multi_reduction <maximumf>, %15, %cst_9 [1] : vector<16x16xf32> to vector<16xf32>
    %17 = vector.shape_cast %16 : vector<16xf32> to vector<16x1xf32>
    %18 = vector.broadcast %17 : vector<16x1xf32> to vector<16x16xf32>
    %19 = arith.subf %15, %18 : vector<16x16xf32>
    %20 = math.exp %19 : vector<16x16xf32>
    %cst_10 = arith.constant dense<0.000000e+00> : vector<16xf32>
    %21 = vector.multi_reduction <add>, %20, %cst_10 [1] : vector<16x16xf32> to vector<16xf32>
    %22 = vector.shape_cast %21 : vector<16xf32> to vector<16x1xf32>
    %23 = vector.broadcast %22 : vector<16x1xf32> to vector<16x16xf32>
    %24 = arith.divf %20, %23 : vector<16x16xf32>
    %cst_11 = arith.constant dense<0.000000e+00> : vector<16x8xf32>
    %25 = tpu.matmul %24, %13, %cst_11 {dimension_numbers = #tpu.dot_dimension_numbers<[1], [0], [0], [1], [0, 0, 1, 1], [], []>} : vector<16x16xf32>, vector<16x8xf32>, vector<16x8xf32> -> vector<16x8xf32>
    %c0_12 = arith.constant 0 : index
    %c0_13 = arith.constant 0 : index
    %26 = vector.load %arg4[%c0_12, %c0_13] : memref<32x32xf32, #tpu.memory_space<vmem>>, vector<8x32xf32>
    %cst_14 = arith.constant dense<0.000000e+00> : vector<16x32xf32>
    %27 = tpu.matmul %25, %26, %cst_14 {dimension_numbers = #tpu.dot_dimension_numbers<[1], [0], [0], [1], [0, 0, 1, 1], [], []>} : vector<16x8xf32>, vector<8x32xf32>, vector<16x32xf32> -> vector<16x32xf32>
    %28 = arith.addf %10, %27 : vector<16x32xf32>
    %29 = vector.extract_strided_slice %6 {offsets = [0, 8], sizes = [16, 8], strides = [1, 1]} : vector<16x32xf32> to vector<16x8xf32>
    %30 = vector.extract_strided_slice %7 {offsets = [0, 8], sizes = [16, 8], strides = [1, 1]} : vector<16x32xf32> to vector<16x8xf32>
    %31 = vector.extract_strided_slice %8 {offsets = [0, 8], sizes = [16, 8], strides = [1, 1]} : vector<16x32xf32> to vector<16x8xf32>
    %cst_15 = arith.constant dense<0.000000e+00> : vector<16x16xf32>
    %32 = tpu.matmul %29, %30, %cst_15 {dimension_numbers = #tpu.dot_dimension_numbers<[1], [1], [0], [0], [0, 0, 1, 0], [], []>} : vector<16x8xf32>, vector<16x8xf32>, vector<16x16xf32> -> vector<16x16xf32>
    %33 = arith.addf %32, %9 : vector<16x16xf32>
    %cst_16 = arith.constant dense<0xFF800000> : vector<16xf32>
    %34 = vector.multi_reduction <maximumf>, %33, %cst_16 [1] : vector<16x16xf32> to vector<16xf32>
    %35 = vector.shape_cast %34 : vector<16xf32> to vector<16x1xf32>
    %36 = vector.broadcast %35 : vector<16x1xf32> to vector<16x16xf32>
    %37 = arith.subf %33, %36 : vector<16x16xf32>
    %38 = math.exp %37 : vector<16x16xf32>
    %cst_17 = arith.constant dense<0.000000e+00> : vector<16xf32>
    %39 = vector.multi_reduction <add>, %38, %cst_17 [1] : vector<16x16xf32> to vector<16xf32>
    %40 = vector.shape_cast %39 : vector<16xf32> to vector<16x1xf32>
    %41 = vector.broadcast %40 : vector<16x1xf32> to vector<16x16xf32>
    %42 = arith.divf %38, %41 : vector<16x16xf32>
    %cst_18 = arith.constant dense<0.000000e+00> : vector<16x8xf32>
    %43 = tpu.matmul %42, %31, %cst_18 {dimension_numbers = #tpu.dot_dimension_numbers<[1], [0], [0], [1], [0, 0, 1, 1], [], []>} : vector<16x16xf32>, vector<16x8xf32>, vector<16x8xf32> -> vector<16x8xf32>
    %c8 = arith.constant 8 : index
    %c0_19 = arith.constant 0 : index
    %44 = vector.load %arg4[%c8, %c0_19] : memref<32x32xf32, #tpu.memory_space<vmem>>, vector<8x32xf32>
    %cst_20 = arith.constant dense<0.000000e+00> : vector<16x32xf32>
    %45 = tpu.matmul %43, %44, %cst_20 {dimension_numbers = #tpu.dot_dimension_numbers<[1], [0], [0], [1], [0, 0, 1, 1], [], []>} : vector<16x8xf32>, vector<8x32xf32>, vector<16x32xf32> -> vector<16x32xf32>
    %46 = arith.addf %28, %45 : vector<16x32xf32>
    %47 = vector.extract_strided_slice %6 {offsets = [0, 16], sizes = [16, 8], strides = [1, 1]} : vector<16x32xf32> to vector<16x8xf32>
    %48 = vector.extract_strided_slice %7 {offsets = [0, 16], sizes = [16, 8], strides = [1, 1]} : vector<16x32xf32> to vector<16x8xf32>
    %49 = vector.extract_strided_slice %8 {offsets = [0, 16], sizes = [16, 8], strides = [1, 1]} : vector<16x32xf32> to vector<16x8xf32>
    %cst_21 = arith.constant dense<0.000000e+00> : vector<16x16xf32>
    %50 = tpu.matmul %47, %48, %cst_21 {dimension_numbers = #tpu.dot_dimension_numbers<[1], [1], [0], [0], [0, 0, 1, 0], [], []>} : vector<16x8xf32>, vector<16x8xf32>, vector<16x16xf32> -> vector<16x16xf32>
    %51 = arith.addf %50, %9 : vector<16x16xf32>
    %cst_22 = arith.constant dense<0xFF800000> : vector<16xf32>
    %52 = vector.multi_reduction <maximumf>, %51, %cst_22 [1] : vector<16x16xf32> to vector<16xf32>
    %53 = vector.shape_cast %52 : vector<16xf32> to vector<16x1xf32>
    %54 = vector.broadcast %53 : vector<16x1xf32> to vector<16x16xf32>
    %55 = arith.subf %51, %54 : vector<16x16xf32>
    %56 = math.exp %55 : vector<16x16xf32>
    %cst_23 = arith.constant dense<0.000000e+00> : vector<16xf32>
    %57 = vector.multi_reduction <add>, %56, %cst_23 [1] : vector<16x16xf32> to vector<16xf32>
    %58 = vector.shape_cast %57 : vector<16xf32> to vector<16x1xf32>
    %59 = vector.broadcast %58 : vector<16x1xf32> to vector<16x16xf32>
    %60 = arith.divf %56, %59 : vector<16x16xf32>
    %cst_24 = arith.constant dense<0.000000e+00> : vector<16x8xf32>
    %61 = tpu.matmul %60, %49, %cst_24 {dimension_numbers = #tpu.dot_dimension_numbers<[1], [0], [0], [1], [0, 0, 1, 1], [], []>} : vector<16x16xf32>, vector<16x8xf32>, vector<16x8xf32> -> vector<16x8xf32>
    %c16 = arith.constant 16 : index
    %c0_25 = arith.constant 0 : index
    %62 = vector.load %arg4[%c16, %c0_25] : memref<32x32xf32, #tpu.memory_space<vmem>>, vector<8x32xf32>
    %cst_26 = arith.constant dense<0.000000e+00> : vector<16x32xf32>
    %63 = tpu.matmul %61, %62, %cst_26 {dimension_numbers = #tpu.dot_dimension_numbers<[1], [0], [0], [1], [0, 0, 1, 1], [], []>} : vector<16x8xf32>, vector<8x32xf32>, vector<16x32xf32> -> vector<16x32xf32>
    %64 = arith.addf %46, %63 : vector<16x32xf32>
    %65 = vector.extract_strided_slice %6 {offsets = [0, 24], sizes = [16, 8], strides = [1, 1]} : vector<16x32xf32> to vector<16x8xf32>
    %66 = vector.extract_strided_slice %7 {offsets = [0, 24], sizes = [16, 8], strides = [1, 1]} : vector<16x32xf32> to vector<16x8xf32>
    %67 = vector.extract_strided_slice %8 {offsets = [0, 24], sizes = [16, 8], strides = [1, 1]} : vector<16x32xf32> to vector<16x8xf32>
    %cst_27 = arith.constant dense<0.000000e+00> : vector<16x16xf32>
    %68 = tpu.matmul %65, %66, %cst_27 {dimension_numbers = #tpu.dot_dimension_numbers<[1], [1], [0], [0], [0, 0, 1, 0], [], []>} : vector<16x8xf32>, vector<16x8xf32>, vector<16x16xf32> -> vector<16x16xf32>
    %69 = arith.addf %68, %9 : vector<16x16xf32>
    %cst_28 = arith.constant dense<0xFF800000> : vector<16xf32>
    %70 = vector.multi_reduction <maximumf>, %69, %cst_28 [1] : vector<16x16xf32> to vector<16xf32>
    %71 = vector.shape_cast %70 : vector<16xf32> to vector<16x1xf32>
    %72 = vector.broadcast %71 : vector<16x1xf32> to vector<16x16xf32>
    %73 = arith.subf %69, %72 : vector<16x16xf32>
    %74 = math.exp %73 : vector<16x16xf32>
    %cst_29 = arith.constant dense<0.000000e+00> : vector<16xf32>
    %75 = vector.multi_reduction <add>, %74, %cst_29 [1] : vector<16x16xf32> to vector<16xf32>
    %76 = vector.shape_cast %75 : vector<16xf32> to vector<16x1xf32>
    %77 = vector.broadcast %76 : vector<16x1xf32> to vector<16x16xf32>
    %78 = arith.divf %74, %77 : vector<16x16xf32>
    %cst_30 = arith.constant dense<0.000000e+00> : vector<16x8xf32>
    %79 = tpu.matmul %78, %67, %cst_30 {dimension_numbers = #tpu.dot_dimension_numbers<[1], [0], [0], [1], [0, 0, 1, 1], [], []>} : vector<16x16xf32>, vector<16x8xf32>, vector<16x8xf32> -> vector<16x8xf32>
    %c24 = arith.constant 24 : index
    %c0_31 = arith.constant 0 : index
    %80 = vector.load %arg4[%c24, %c0_31] : memref<32x32xf32, #tpu.memory_space<vmem>>, vector<8x32xf32>
    %cst_32 = arith.constant dense<0.000000e+00> : vector<16x32xf32>
    %81 = tpu.matmul %79, %80, %cst_32 {dimension_numbers = #tpu.dot_dimension_numbers<[1], [0], [0], [1], [0, 0, 1, 1], [], []>} : vector<16x8xf32>, vector<8x32xf32>, vector<16x32xf32> -> vector<16x32xf32>
    %82 = arith.addf %64, %81 : vector<16x32xf32>
    %c0_33 = arith.constant 0 : index
    %c0_34 = arith.constant 0 : index
    %83 = vector.load %arg5[%c0_33, %c0_34] : memref<1x32xf32, #tpu.memory_space<vmem>>, vector<1x32xf32>
    %84 = vector.broadcast %83 : vector<1x32xf32> to vector<16x32xf32>
    %85 = arith.addf %82, %84 : vector<16x32xf32>
    %86 = arith.addf %0, %85 : vector<16x32xf32>
    %c0_35 = arith.constant 0 : index
    %c0_36 = arith.constant 0 : index
    %87 = vector.load %arg6[%c0_35, %c0_36] : memref<1x32xf32, #tpu.memory_space<vmem>>, vector<1x32xf32>
    %c0_37 = arith.constant 0 : index
    %c0_38 = arith.constant 0 : index
    %88 = vector.load %arg7[%c0_37, %c0_38] : memref<1x32xf32, #tpu.memory_space<vmem>>, vector<1x32xf32>
    %cst_39 = arith.constant dense<0.000000e+00> : vector<16xf32>
    %89 = vector.multi_reduction <add>, %86, %cst_39 [1] : vector<16x32xf32> to vector<16xf32>
    %90 = vector.shape_cast %89 : vector<16xf32> to vector<16x1xf32>
    %cst_40 = arith.constant 3.200000e+01 : f32
    %91 = vector.broadcast %cst_40 : f32 to vector<16x1xf32>
    %92 = arith.divf %90, %91 : vector<16x1xf32>
    %93 = vector.broadcast %92 : vector<16x1xf32> to vector<16x32xf32>
    %94 = arith.subf %86, %93 : vector<16x32xf32>
    %95 = arith.mulf %94, %94 : vector<16x32xf32>
    %cst_41 = arith.constant dense<0.000000e+00> : vector<16xf32>
    %96 = vector.multi_reduction <add>, %95, %cst_41 [1] : vector<16x32xf32> to vector<16xf32>
    %97 = vector.shape_cast %96 : vector<16xf32> to vector<16x1xf32>
    %cst_42 = arith.constant 3.200000e+01 : f32
    %98 = vector.broadcast %cst_42 : f32 to vector<16x1xf32>
    %99 = arith.divf %97, %98 : vector<16x1xf32>
    %100 = vector.broadcast %92 : vector<16x1xf32> to vector<16x32xf32>
    %101 = arith.subf %86, %100 : vector<16x32xf32>
    %cst_43 = arith.constant 9.99999974E-6 : f32
    %102 = vector.broadcast %cst_43 : f32 to vector<16x1xf32>
    %103 = arith.addf %99, %102 : vector<16x1xf32>
    %104 = math.rsqrt %103 : vector<16x1xf32>
    %105 = vector.broadcast %104 : vector<16x1xf32> to vector<16x32xf32>
    %106 = arith.mulf %101, %105 : vector<16x32xf32>
    %107 = vector.broadcast %87 : vector<1x32xf32> to vector<16x32xf32>
    %108 = arith.mulf %106, %107 : vector<16x32xf32>
    %109 = vector.broadcast %88 : vector<1x32xf32> to vector<16x32xf32>
    %110 = arith.addf %108, %109 : vector<16x32xf32>
    %c0_44 = arith.constant 0 : index
    %c0_45 = arith.constant 0 : index
    %111 = vector.load %arg8[%c0_44, %c0_45] : memref<32x64xf32, #tpu.memory_space<vmem>>, vector<32x64xf32>
    %cst_46 = arith.constant dense<0.000000e+00> : vector<16x64xf32>
    %112 = tpu.matmul %110, %111, %cst_46 {dimension_numbers = #tpu.dot_dimension_numbers<[1], [0], [0], [1], [0, 0, 1, 1], [], []>} : vector<16x32xf32>, vector<32x64xf32>, vector<16x64xf32> -> vector<16x64xf32>
    %c0_47 = arith.constant 0 : index
    %c0_48 = arith.constant 0 : index
    %113 = vector.load %arg9[%c0_47, %c0_48] : memref<1x64xf32, #tpu.memory_space<vmem>>, vector<1x64xf32>
    %114 = vector.broadcast %113 : vector<1x64xf32> to vector<16x64xf32>
    %115 = arith.addf %112, %114 : vector<16x64xf32>
    %cst_49 = arith.constant 0.000000e+00 : f32
    %116 = vector.broadcast %cst_49 : f32 to vector<16x64xf32>
    %117 = arith.maximumf %115, %116 : vector<16x64xf32>
    %c0_50 = arith.constant 0 : index
    %c0_51 = arith.constant 0 : index
    %118 = vector.load %arg10[%c0_50, %c0_51] : memref<64x32xf32, #tpu.memory_space<vmem>>, vector<64x32xf32>
    %cst_52 = arith.constant dense<0.000000e+00> : vector<16x32xf32>
    %119 = tpu.matmul %117, %118, %cst_52 {dimension_numbers = #tpu.dot_dimension_numbers<[1], [0], [0], [1], [0, 0, 1, 1], [], []>} : vector<16x64xf32>, vector<64x32xf32>, vector<16x32xf32> -> vector<16x32xf32>
    %c0_53 = arith.constant 0 : index
    %c0_54 = arith.constant 0 : index
    %120 = vector.load %arg11[%c0_53, %c0_54] : memref<1x32xf32, #tpu.memory_space<vmem>>, vector<1x32xf32>
    %121 = vector.broadcast %120 : vector<1x32xf32> to vector<16x32xf32>
    %122 = arith.addf %119, %121 : vector<16x32xf32>
    %123 = arith.addf %110, %122 : vector<16x32xf32>
    %c0_55 = arith.constant 0 : index
    %c0_56 = arith.constant 0 : index
    %124 = vector.load %arg12[%c0_55, %c0_56] : memref<1x32xf32, #tpu.memory_space<vmem>>, vector<1x32xf32>
    %c0_57 = arith.constant 0 : index
    %c0_58 = arith.constant 0 : index
    %125 = vector.load %arg13[%c0_57, %c0_58] : memref<1x32xf32, #tpu.memory_space<vmem>>, vector<1x32xf32>
    %cst_59 = arith.constant dense<0.000000e+00> : vector<16xf32>
    %126 = vector.multi_reduction <add>, %123, %cst_59 [1] : vector<16x32xf32> to vector<16xf32>
    %127 = vector.shape_cast %126 : vector<16xf32> to vector<16x1xf32>
    %cst_60 = arith.constant 3.200000e+01 : f32
    %128 = vector.broadcast %cst_60 : f32 to vector<16x1xf32>
    %129 = arith.divf %127, %128 : vector<16x1xf32>
    %130 = vector.broadcast %129 : vector<16x1xf32> to vector<16x32xf32>
    %131 = arith.subf %123, %130 : vector<16x32xf32>
    %132 = arith.mulf %131, %131 : vector<16x32xf32>
    %cst_61 = arith.constant dense<0.000000e+00> : vector<16xf32>
    %133 = vector.multi_reduction <add>, %132, %cst_61 [1] : vector<16x32xf32> to vector<16xf32>
    %134 = vector.shape_cast %133 : vector<16xf32> to vector<16x1xf32>
    %cst_62 = arith.constant 3.200000e+01 : f32
    %135 = vector.broadcast %cst_62 : f32 to vector<16x1xf32>
    %136 = arith.divf %134, %135 : vector<16x1xf32>
    %137 = vector.broadcast %129 : vector<16x1xf32> to vector<16x32xf32>
    %138 = arith.subf %123, %137 : vector<16x32xf32>
    %cst_63 = arith.constant 9.99999974E-6 : f32
    %139 = vector.broadcast %cst_63 : f32 to vector<16x1xf32>
    %140 = arith.addf %136, %139 : vector<16x1xf32>
    %141 = math.rsqrt %140 : vector<16x1xf32>
    %142 = vector.broadcast %141 : vector<16x1xf32> to vector<16x32xf32>
    %143 = arith.mulf %138, %142 : vector<16x32xf32>
    %144 = vector.broadcast %124 : vector<1x32xf32> to vector<16x32xf32>
    %145 = arith.mulf %143, %144 : vector<16x32xf32>
    %146 = vector.broadcast %125 : vector<1x32xf32> to vector<16x32xf32>
    %147 = arith.addf %145, %146 : vector<16x32xf32>
    %c0_64 = arith.constant 0 : index
    %c0_65 = arith.constant 0 : index
    %148 = vector.load %arg14[%c0_64, %c0_65] : memref<16x32xf32, #tpu.memory_space<vmem>>, vector<16x32xf32>
    tpu.vector_store %arg14[%c0_64, %c0_65], %147 {strides = array<i32>} : memref<16x32xf32, #tpu.memory_space<vmem>>, vector<16x32xf32>,
    return
  }
}

</mosaic_0001>

<bundles_post_ra>
// kernel: gpt_decoder_pallas.1
= control target key start
LH: loop header
LB: loop body
LE: loop exit
PB: predicated region body
PF: predicated region fallthrough
CT: control target
= control target key end

     0   :  { %vm61_vm0 = vcmask 261120   ;;  %s2207_s0 = inlined_call_operand.vmem [shape: f32[16,32], index: 0, kind: input, shape index: {}]   ;;  %s2208_s1 = inlined_call_operand.vmem [shape: f32[16,16], index: 1, kind: input, shape index: {}]   ;;  %s2209_s2 = inlined_call_operand.vmem [shape: f32[32,96], index: 2, kind: input, shape index: {}]   ;;  %s2210_s3 = inlined_call_operand.vmem [shape: f32[1,96], index: 3, kind: input, shape index: {}]   ;;  %s2211_s4 = inlined_call_operand.vmem [shape: f32[32,32], index: 4, kind: input, shape index: {}]   ;;  %s2212_s5 = inlined_call_operand.vmem [shape: f32[1,32], index: 5, kind: input, shape index: {}]   ;;  %s2213_s6 = inlined_call_operand.vmem [shape: f32[1,32], index: 6, kind: input, shape index: {}]   ;;  %s2214_s7 = inlined_call_operand.vmem [shape: f32[1,32], index: 7, kind: input, shape index: {}]   ;;  %s2215_s8 = inlined_call_operand.vmem [shape: f32[32,64], index: 8, kind: input, shape index: {}]   ;;  %s2216_s9 = inlined_call_operand.vmem [shape: f32[1,64], index: 9, kind: input, shape index: {}]   ;;  %s2217_s10 = inlined_call_operand.vmem [shape: f32[64,32], index: 10, kind: input, shape index: {}]   ;;  %s2218_s11 = inlined_call_operand.vmem [shape: f32[1,32], index: 11, kind: input, shape index: {}]   ;;  %s2219_s12 = inlined_call_operand.vmem [shape: f32[1,32], index: 12, kind: input, shape index: {}]   ;;  %s2220_s13 = inlined_call_operand.vmem [shape: f32[1,32], index: 13, kind: input, shape index: {}]   ;;  %s2221_s14 = inlined_call_operand.hbm [shape: f32[16,32], index: 14, kind: output, shape index: {}]  }
   0x1   :  { %v53_v0 = vld [vmem:[%s2209_s2 + $0x18] sm:$0xff]  ;;  %v52_v1 = vld [vmem:[%s2209_s2 + $0x10] sm:$0xff]  ;;  %v1991_v2 = vld [vmem:[%s2207_s0] sm:$0xff] }
   0x2   :  { %1700 = vmatprep.subr.mxu0 %v53_v0  ;;  %v51_v3 = vld [vmem:[%s2209_s2 + $0x8] sm:$0xff]  ;;  %1708 = vmatprep.mubr.msk.f32.mxu0 %vm61_vm0, %v1991_v2 }
   0x3   :  { %1701 = vmatpush3.msra.mxu0 %v53_v0 }
   0x4   :  { %19 = vsyncpa [#allocation3], 0  ;;  %1702 = vmatprep.subr.mxu0 %v52_v1  ;;  %v50_v4 = vld [vmem:[%s2209_s2] sm:$0xff]  ;;  %v2004_v5 = vld [vmem:[%s2207_s0 + $0x8] sm:$0xff]  ;;  %vm151_vm1 = vcmask 64512   ;;  %s1893_s2 = smov 88  }
   0x5   :  { %1703 = vmatpush3.msra.mxu0 %v52_v1  ;;  %v1588_v6 = vld [vmem:[%s2210_s3] ss:$0 sm:$0xff]  ;;  %s1894_s0 = smov 96   ;;  %s1895_s3 = smov 120   ;;  %v2038_v17 = vld [vmem:[%s2208_s1 + $0x8] sm:$0xff]  ;;  %vm235_vm2 = vcmask 130048  }
   0x6   :  { %1704 = vmatprep.subr.mxu0 %v51_v3  ;;  %v2043_v19 = vld [vmem:[%s2208_s1] sm:$0xff]  ;;  %s1896_s1 = smov 64   ;;  %s1897_s15 = smov 56   ;;  %vm1442_vm3 = vcmask 523264  }
   0x7   :  { %1705 = vmatpush3.msra.mxu0 %v51_v3  ;;  %s1898_s16 = smov 80   ;;  %s1899_s17 = smov 112  }
   0x8   :  { %1706 = vmatprep.subr.mxu0 %v50_v4  ;;  %s1900_s18 = smov 72   ;;  %s1901_s19 = smov 104  }
   0x9   :  { %1707 = vmatpush3.msra.mxu0 %v50_v4  ;;  %v546_v4 = vld [vmem:[%s2211_s4 + $0x8] sm:$0xff]  ;;  %s1902_s24 = smov 48   ;;  %s1903_s25 = smov 40  }
   0xa   :  { %1709 = vmatmul.mubr.msk.f32.vlgmr.msra.gmra.mxu0 %vm61_vm0, %v2004_v5 }
  0xca   :  { %v1710_v7 = vpop.f32.mrf.mxu0 }
  0xcb   :  { %v2011_v8 = vadd.f32 %v1710_v7, %v1588_v6 }
  0xcc   :  { %v134_v9 = vpop.f32.mrf.mxu0 }
  0xcd   :  { %v2013_v10 = vadd.f32 %v1588_v6, %v134_v9  ;;  %352 = vrot.lane.b32.xlu1 %v2011_v8, %s1893_s2  ;;  %149 = vrot.lane.b32.xlu0 %v2011_v8, %s1894_s0  ;;  %v345_v6 = vld [vmem:[%s2211_s4] sm:$0xff] }
  0xcf   :  { %1715 = vmatprep.mubr.msk.f32.mxu1 %vm151_vm1, %v2013_v10 }
  0xd1   :  { %350 = vrot.lane.b32.xlu1 %v2013_v10, %s1893_s2  ;;  %147 = vrot.lane.b32.xlu0 %v2013_v10, %s1894_s0 }
  0xd5   :  { %348 = vrot.lane.b32.xlu1 %v2011_v8, %s1895_s3  ;;  %346 = vrot.lane.b32.xlu0 %v2013_v10, %s1895_s3 }
 0x13f   :  { %v150_v11 = vpop.permute.xlu0 %149  ;;  %v353_v12 = vpop.permute.xlu1 %352 }
 0x140   :  { %1711 = vmatprep.subr.msk.mxu1 %vm151_vm1, %v150_v11 }
 0x141   :  { %1712 = vmatpush3.xpose.msk.msra.mxu1 %vm151_vm1, %v150_v11 }
 0x143   :  { %v148_v13 = vpop.permute.xlu0 %147  ;;  %v351_v15 = vpop.permute.xlu1 %350 }
 0x144   :  { %1713 = vmatprep.subr.msk.mxu1 %vm151_vm1, %v148_v13 }
 0x145   :  { %1714 = vmatpush3.xpose.msk.msra.mxu1 %vm151_vm1, %v148_v13 }
 0x146   :  { %1725 = vmatprep.subr.msk.mxu1 %vm151_vm1, %v353_v12 }
 0x147   :  { %v347_v14 = vpop.permute.xlu0 %346  ;;  %v349_v16 = vpop.permute.xlu1 %348 }
 0x148   :  { %1716 = vmatmul.mubr.msk.f32.vlgmr.msra.gmra.mxu1 %vm151_vm1, %v2011_v8 }
 0x149   :  { %1726 = vmatpush3.xpose.msk.msra.mxu1 %vm151_vm1, %v353_v12  ;;  %1729 = vmatprep.mubr.msk.f32.mxu1 %vm151_vm1, %v347_v14 }
 0x14a   :  { %1727 = vmatprep.subr.msk.mxu1 %vm151_vm1, %v351_v15 }
 0x14d   :  { %1728 = vmatpush3.xpose.msk.msra.mxu1 %vm151_vm1, %v351_v15 }
 0x150   :  { %1730 = vmatmul.mubr.msk.f32.vlgmr.msra.gmra.mxu1 %vm151_vm1, %v349_v16 }
 0x208   :  { %v1717_v18 = vpop.f32.mrf.mxu1 }
 0x209   :  { %v232_v20 = vadd.f32 %v1717_v18, %v2038_v17 }
 0x20a   :  { %v226_v21 = vpop.f32.mrf.mxu1 }
 0x20b   :  { %v227_v22 = vadd.f32 %v226_v21, %v2043_v19  ;;  %v239_v23 = vsel %vm235_vm2, %v232_v20, -inf }
 0x20c   :  { %240 = vmax.xlane.f32.xlu1 %v239_v23 }
 0x20d   :  { %v236_v24 = vsel %vm235_vm2, %v227_v22, -inf }
 0x20e   :  { %237 = vmax.xlane.f32.xlu0 %v236_v24 }
 0x210   :  { %v1731_v25 = vpop.f32.mrf.mxu1 }
 0x211   :  { %v434_v28 = vadd.f32 %v1731_v25, %v2038_v17 }
 0x212   :  { %v428_v26 = vpop.f32.mrf.mxu1 }
 0x213   :  { %v429_v27 = vadd.f32 %v428_v26, %v2043_v19  ;;  %v440_v30 = vsel %vm235_vm2, %v434_v28, -inf }
 0x215   :  { %v437_v29 = vsel %vm235_vm2, %v429_v27, -inf }
 0x216   :  { %438 = vmax.xlane.f32.xlu0 %v437_v29 }
 0x21a   :  { %441 = vmax.xlane.f32.xlu0 %v440_v30 }
 0x21d   :  { %260 = vrot.lane.b32.xlu1 %v2011_v8, %s1896_s1 }
 0x295   :  { %v241_v31 = vpop.xlane.xlu1 %240 }
 0x296   :  { %v243_v32 = vsub.f32 %v232_v20, %v241_v31 }
 0x297   :  { %v238_v33 = vpop.xlane.xlu0 %237 }
 0x298   :  { %v246_v34 = vmul.f32 1.442695, %v243_v32  ;;  %v242_v35 = vsub.f32 %v227_v22, %v238_v33 }
 0x299   :  { %v261_v36 = vpop.permute.xlu1 %260 }
 0x29a   :  { %1831 = vpow2.f32 %v246_v34  ;;  %v244_v37 = vmul.f32 1.442695, %v242_v35  ;;  %1718 = vmatprep.subr.mxu0 %v261_v36 }
 0x29b   :  { %1719 = vmatpush3.msra.mxu0 %v261_v36 }
 0x29c   :  { %1833 = vpow2.f32 %v244_v37 }
 0x29f   :  { %v439_v38 = vpop.xlane.xlu0 %438 }
 0x2a0   :  { %v443_v48 = vsub.f32 %v429_v27, %v439_v38 }
 0x2a2   :  { %v445_v49 = vmul.f32 1.442695, %v443_v48 }
 0x2a3   :  { %v442_v39 = vpop.xlane.xlu0 %441 }
 0x2a4   :  { %v444_v40 = vsub.f32 %v434_v28, %v442_v39 }
 0x2a6   :  { %v447_v41 = vmul.f32 1.442695, %v444_v40 }
 0x2a7   :  { %v1832_v42 = vpop.eup %1831 }
 0x2a8   :  { %1835 = vpow2.f32 %v447_v41  ;;  %v251_v43 = vsel %vm235_vm2, %v1832_v42, 0.0 }
 0x2a9   :  { %v1834_v44 = vpop.eup %1833  ;;  %252 = vadd.xlane.f32.xlu0 %v251_v43  ;;  %1837 = vpow2.f32 %v445_v49 }
 0x2aa   :  { %v248_v45 = vsel %vm235_vm2, %v1834_v44, 0.0 }
 0x2ab   :  { %249 = vadd.xlane.f32.xlu1 %v248_v45 }
 0x2b5   :  { %v1836_v46 = vpop.eup %1835 }
 0x2b6   :  { %v452_v47 = vsel %vm235_vm2, %v1836_v46, 0.0  ;;  %v1838_v50 = vpop.eup %1837 }
 0x2b7   :  { %453 = vadd.xlane.f32.xlu0 %v452_v47  ;;  %v449_v51 = vsel %vm235_vm2, %v1838_v50, 0.0 }
 0x2bc   :  { %461 = vrot.lane.b32.xlu1 %v2011_v8, %s1897_s15 }
 0x2cd   :  { %258 = vrot.lane.b32.xlu0 %v2013_v10, %s1896_s1 }
 0x2d1   :  { %715 = vrot.lane.b32.xlu0 %v2011_v8, %s1898_s16 }
 0x2d5   :  { %709 = vrot.lane.b32.xlu0 %v2013_v10, %s1899_s17 }
 0x2d9   :  { %999 = vrot.lane.b32.xlu0 %v2011_v8, %s1900_s18 }
 0x2dd   :  { %993 = vrot.lane.b32.xlu0 %v2013_v10, %s1901_s19 }
 0x2e0   :  { %450 = vadd.xlane.f32.xlu1 %v449_v51 }
 0x2f1   :  { %459 = vrot.lane.b32.xlu1 %v2013_v10, %s1897_s15 }
 0x2f5   :  { %713 = vrot.lane.b32.xlu1 %v2013_v10, %s1898_s16 }
 0x2f9   :  { %711 = vrot.lane.b32.xlu1 %v2011_v8, %s1899_s17 }
 0x2fd   :  { %997 = vrot.lane.b32.xlu1 %v2013_v10, %s1900_s18  ;;  %s1904_s18 = smov [#allocation2]  }
 0x301   :  { %995 = vrot.lane.b32.xlu1 %v2011_v8, %s1901_s19  ;;  %s1577_s19 = sshll.u32 %s1904_s18, 4  ;;  %s1578_s19 = int_to_ptr.vmem [resolvable:$true] %s1577_s19 }
 0x302   :  { %s1871_s20 = scalar_lea.vmem %s1578_s19, 256  ;;  %p1876_p1 = scmp.lt.s32.totalorder %s1578_s19, %s1578_s19 }
 0x303   :  { %p1872_p0 = scmp.ne.s32.totalorder %s1578_s19, %s1871_s20  ;;  %p1877_p2 = scmp.lt.s32.totalorder %s1871_s20, %s1871_s20 }
 0x305   :  { %p1878_p3 = por %p1877_p2, %p1876_p1 }
 0x307   :  { %p1879_p4 = pnand %p1878_p3, %p1872_p0 }
 0x332   :  { %v253_v52 = vpop.xlane.xlu0 %252 }
 0x333   :  { %1839 = vrcp.f32 %v253_v52 }
 0x334   :  { %v250_v53 = vpop.xlane.xlu1 %249 }
 0x335   :  { %1841 = vrcp.f32 %v250_v53 }
 0x338   :  { %v462_v60 = vpop.permute.xlu1 %461 }
 0x340   :  { %v454_v54 = vpop.xlane.xlu0 %453  ;;  %v1840_v55 = vpop.eup %1839 }
 0x341   :  { %v257_v59 = vmul.f32 %v1840_v55, %v1832_v42  ;;  %1843 = vrcp.f32 %v454_v54 }
 0x342   :  { %v1842_v56 = vpop.eup %1841 }
 0x343   :  { %v255_v57 = vmul.f32 %v1842_v56, %v1834_v44 }
 0x344   :  { %v259_v58 = vpop.permute.xlu0 %258 }
 0x345   :  { %1720 = vmatprep.subr.mxu0 %v259_v58  ;;  %1722 = vmatprep.mubr.msk.f32.mxu0 %vm235_vm2, %v255_v57 }
 0x346   :  { %1721 = vmatpush3.msra.mxu0 %v259_v58 }
 0x347   :  { %1723 = vmatmul.mubr.msk.f32.vlgmr.msra.gmra.mxu0 %vm235_vm2, %v257_v59  ;;  %1732 = vmatprep.subr.mxu0 %v462_v60  ;;  %v909_v59 = vld [vmem:[%s2211_s4 + $0x10] sm:$0xff] }
 0x348   :  { %1733 = vmatpush3.msra.mxu0 %v462_v60  ;;  %v716_v9 = vpop.permute.xlu0 %715 }
 0x34c   :  { %v710_v14 = vpop.permute.xlu0 %709 }
 0x34e   :  { %v1844_v63 = vpop.eup %1843 }
 0x34f   :  { %v458_v3 = vmul.f32 %v1844_v63, %v1836_v46 }
 0x350   :  { %v1000_v16 = vpop.permute.xlu0 %999 }
 0x354   :  { %v994_v20 = vpop.permute.xlu0 %993 }
 0x369   :  { %v451_v61 = vpop.xlane.xlu1 %450 }
 0x36a   :  { %1845 = vrcp.f32 %v451_v61 }
 0x36d   :  { %v460_v62 = vpop.permute.xlu1 %459 }
 0x36e   :  { %1734 = vmatprep.subr.mxu0 %v460_v62 }
 0x36f   :  { %1735 = vmatpush3.msra.mxu0 %v460_v62 }
 0x370   :  { %1739 = vmatprep.subr.mxu0 %v546_v4 }
 0x371   :  { %v714_v15 = vpop.permute.xlu1 %713 }
 0x375   :  { %v712_v18 = vpop.permute.xlu1 %711 }
 0x377   :  { %v1846_v0 = vpop.eup %1845 }
 0x378   :  { %v456_v1 = vmul.f32 %v1846_v0, %v1838_v50 }
 0x379   :  { %v998_v21 = vpop.permute.xlu1 %997 }
 0x37a   :  { %1736 = vmatprep.mubr.msk.f32.mxu0 %vm235_vm2, %v456_v1 }
 0x37b   :  { %1737 = vmatmul.mubr.msk.f32.vlgmr.msra.gmra.mxu0 %vm235_vm2, %v458_v3 }
 0x37c   :  { %1740 = vmatpush3.msra.mxu0 %v546_v4 }
 0x37d   :  { %1744 = vmatprep.subr.mxu0 %v345_v6  ;;  %v996_v22 = vpop.permute.xlu1 %995 }
 0x407   :  { %v1724_v7 = vpop.f32.mrf.mxu0 }
 0x409   :  { %v336_v11 = vpop.f32.mrf.mxu0 }
 0x43b   :  { %v1738_v12 = vpop.f32.mrf.mxu0 }
 0x43d   :  { %v537_v13 = vpop.f32.mrf.mxu0 }
 0x43e   :  { %1741 = vmatprep.mubr.msk.f32.mxu0 %vm151_vm1, %v537_v13 }
 0x43f   :  { %1742 = vmatmul.mubr.msk.f32.vlgmr.msra.gmra.mxu0 %vm151_vm1, %v1738_v12 }
 0x440   :  { %1745 = vmatpush3.msra.mxu0 %v345_v6  ;;  %1746 = vmatprep.mubr.msk.f32.mxu0 %vm151_vm1, %v336_v11 }
 0x441   :  { %1749 = vmatprep.subr.msk.mxu0 %vm151_vm1, %v716_v9 }
 0x443   :  { %1747 = vmatmul.mubr.msk.f32.vlgmr.msra.gmra.mxu0 %vm151_vm1, %v1724_v7 }
 0x444   :  { %1750 = vmatpush3.xpose.msk.msra.mxu0 %vm151_vm1, %v716_v9  ;;  %1753 = vmatprep.mubr.msk.f32.mxu0 %vm151_vm1, %v710_v14 }
 0x445   :  { %1751 = vmatprep.subr.msk.mxu0 %vm151_vm1, %v714_v15 }
 0x448   :  { %1752 = vmatpush3.xpose.msk.msra.mxu0 %vm151_vm1, %v714_v15 }
 0x449   :  { %1768 = vmatprep.subr.msk.mxu0 %vm151_vm1, %v1000_v16 }
 0x44b   :  { %1754 = vmatmul.mubr.msk.f32.vlgmr.msra.gmra.mxu0 %vm151_vm1, %v712_v18 }
 0x44c   :  { %1769 = vmatpush3.xpose.msk.msra.mxu0 %vm151_vm1, %v1000_v16  ;;  %1772 = vmatprep.mubr.msk.f32.mxu0 %vm151_vm1, %v994_v20 }
 0x44d   :  { %1770 = vmatprep.subr.msk.mxu0 %vm151_vm1, %v998_v21 }
 0x450   :  { %1771 = vmatpush3.xpose.msk.msra.mxu0 %vm151_vm1, %v998_v21 }
 0x453   :  { %1773 = vmatmul.mubr.msk.f32.vlgmr.msra.gmra.mxu0 %vm151_vm1, %v996_v22 }
 0x4ff   :  { %v1743_v23 = vpop.f32.mrf.mxu0 }
 0x501   :  { %v619_v24 = vpop.f32.mrf.mxu0 }
 0x503   :  { %v1748_v25 = vpop.f32.mrf.mxu0 }
 0x504   :  { %v2097_v26 = vadd.f32 %v1748_v25, %v1743_v23 }
 0x505   :  { %v700_v27 = vpop.f32.mrf.mxu0 }
 0x506   :  { %v2099_v28 = vadd.f32 %v700_v27, %v619_v24  ;;  %v1623_v27 = vld [vmem:[%s2212_s5] ss:$0 sm:$0xff] }
 0x50b   :  { %v1755_v29 = vpop.f32.mrf.mxu0 }
 0x50c   :  { %v797_v30 = vadd.f32 %v1755_v29, %v2038_v17 }
 0x50d   :  { %v791_v31 = vpop.f32.mrf.mxu0 }
 0x50e   :  { %v792_v32 = vadd.f32 %v791_v31, %v2043_v19  ;;  %v803_v33 = vsel %vm235_vm2, %v797_v30, -inf }
 0x50f   :  { %804 = vmax.xlane.f32.xlu1 %v803_v33 }
 0x510   :  { %v800_v34 = vsel %vm235_vm2, %v792_v32, -inf }
 0x511   :  { %801 = vmax.xlane.f32.xlu0 %v800_v34 }
 0x513   :  { %v1774_v35 = vpop.f32.mrf.mxu0 }
 0x514   :  { %v1081_v53 = vadd.f32 %v1774_v35, %v2038_v17 }
 0x515   :  { %v1075_v36 = vpop.f32.mrf.mxu0 }
 0x516   :  { %v1076_v37 = vadd.f32 %v1075_v36, %v2043_v19  ;;  %v1087_v55 = vsel %vm235_vm2, %v1081_v53, -inf }
 0x518   :  { %v1084_v38 = vsel %vm235_vm2, %v1076_v37, -inf }
 0x520   :  { %824 = vrot.lane.b32.xlu1 %v2011_v8, %s1902_s24 }
 0x544   :  { %1085 = vmax.xlane.f32.xlu1 %v1084_v38 }
 0x598   :  { %v805_v39 = vpop.xlane.xlu1 %804 }
 0x599   :  { %v807_v40 = vsub.f32 %v797_v30, %v805_v39 }
 0x59a   :  { %v802_v41 = vpop.xlane.xlu0 %801 }
 0x59b   :  { %v810_v42 = vmul.f32 1.442695, %v807_v40  ;;  %v806_v43 = vsub.f32 %v792_v32, %v802_v41 }
 0x59c   :  { %v825_v44 = vpop.permute.xlu1 %824 }
 0x59d   :  { %1847 = vpow2.f32 %v810_v42  ;;  %v808_v45 = vmul.f32 1.442695, %v806_v43  ;;  %1756 = vmatprep.subr.mxu1 %v825_v44 }
 0x59e   :  { %1757 = vmatpush3.msra.mxu1 %v825_v44 }
 0x59f   :  { %1849 = vpow2.f32 %v808_v45  ;;  %v1335_v45 = vld [vmem:[%s2215_s8 + $0x10] sm:$0xff] }
 0x5aa   :  { %v1848_v46 = vpop.eup %1847 }
 0x5ab   :  { %v815_v47 = vsel %vm235_vm2, %v1848_v46, 0.0 }
 0x5ac   :  { %v1850_v48 = vpop.eup %1849  ;;  %816 = vadd.xlane.f32.xlu0 %v815_v47  ;;  %v1333_v47 = vld [vmem:[%s2215_s8] sm:$0xff] }
 0x5ad   :  { %v812_v19 = vsel %vm235_vm2, %v1850_v48, 0.0 }
 0x5b0   :  { %813 = vadd.xlane.f32.xlu0 %v812_v19  ;;  %v1433_v19 = vld [vmem:[%s2217_s10 + $0x30] sm:$0xff] }
 0x5c6   :  { %822 = vrot.lane.b32.xlu0 %v2013_v10, %s1902_s24 }
 0x5cd   :  { %v1086_v49 = vpop.xlane.xlu1 %1085 }
 0x5ce   :  { %v1090_v50 = vsub.f32 %v1076_v37, %v1086_v49  ;;  %v1432_v49 = vld [vmem:[%s2217_s10 + $0x28] sm:$0xff] }
 0x5d0   :  { %v1092_v51 = vmul.f32 1.442695, %v1090_v50  ;;  %v1431_v50 = vld [vmem:[%s2217_s10 + $0x20] sm:$0xff] }
 0x5d2   :  { %1851 = vpow2.f32 %v1092_v51 }
 0x5df   :  { %v1852_v52 = vpop.eup %1851 }
 0x5e0   :  { %v1096_v54 = vsel %vm235_vm2, %v1852_v52, 0.0 }
 0x5e1   :  { %1097 = vadd.xlane.f32.xlu1 %v1096_v54 }
 0x5e5   :  { %1088 = vmax.xlane.f32.xlu0 %v1087_v55 }
 0x5f2   :  { %1108 = vrot.lane.b32.xlu1 %v2011_v8, %s1903_s25 }
 0x635   :  { %v817_v56 = vpop.xlane.xlu0 %816 }
 0x636   :  { %1853 = vrcp.f32 %v817_v56 }
 0x639   :  { %v814_v57 = vpop.xlane.xlu0 %813 }
 0x63a   :  { %1855 = vrcp.f32 %v814_v57 }
 0x63d   :  { %v823_v58 = vpop.permute.xlu0 %822 }
 0x63e   :  { %1758 = vmatprep.subr.mxu1 %v823_v58 }
 0x63f   :  { %1759 = vmatpush3.msra.mxu1 %v823_v58  ;;  %v1624_v58 = vld [vmem:[%s2213_s6] ss:$0 sm:$0xff] }
 0x640   :  { %1763 = vmatprep.subr.mxu1 %v909_v59 }
 0x643   :  { %v1854_v17 = vpop.eup %1853 }
 0x644   :  { %v821_v62 = vmul.f32 %v1854_v17, %v1848_v46  ;;  %v1334_v46 = vld [vmem:[%s2215_s8 + $0x8] sm:$0xff] }
 0x647   :  { %v1856_v60 = vpop.eup %1855 }
 0x648   :  { %v819_v61 = vmul.f32 %v1856_v60, %v1850_v48  ;;  %v1434_v48 = vld [vmem:[%s2217_s10 + $0x38] sm:$0xff] }
 0x64a   :  { %1760 = vmatprep.mubr.msk.f32.mxu1 %vm235_vm2, %v819_v61 }
 0x64b   :  { %1761 = vmatmul.mubr.msk.f32.vlgmr.msra.gmra.mxu1 %vm235_vm2, %v821_v62  ;;  %v1625_v62 = vld [vmem:[%s2214_s7] ss:$0 sm:$0xff] }
 0x64c   :  { %1764 = vmatpush3.msra.mxu1 %v909_v59 }
 0x66a   :  { %v1098_v8 = vpop.xlane.xlu1 %1097 }
 0x66e   :  { %v1109_v63 = vpop.permute.xlu1 %1108  ;;  %v1089_v0 = vpop.xlane.xlu0 %1088 }
 0x66f   :  { %v1091_v1 = vsub.f32 %v1081_v53, %v1089_v0  ;;  %1775 = vmatprep.subr.mxu1 %v1109_v63 }
 0x671   :  { %v1094_v3 = vmul.f32 1.442695, %v1091_v1  ;;  %v1430_v1 = vld [vmem:[%s2217_s10 + $0x18] sm:$0xff] }
 0x673   :  { %1857 = vpow2.f32 %v1094_v3  ;;  %v1429_v3 = vld [vmem:[%s2217_s10 + $0x10] sm:$0xff] }
 0x674   :  { %1859 = vrcp.f32 %v1098_v8 }
 0x680   :  { %v1858_v4 = vpop.eup %1857 }
 0x681   :  { %v1099_v6 = vsel %vm235_vm2, %v1858_v4, 0.0  ;;  %v1860_v7 = vpop.eup %1859 }
 0x682   :  { %1100 = vadd.xlane.f32.xlu0 %v1099_v6  ;;  %v1103_v13 = vmul.f32 %v1860_v7, %v1852_v52  ;;  %v1427_v6 = vld [vmem:[%s2217_s10] sm:$0xff] }
 0x683   :  { %v1626_v7 = vld [vmem:[%s2216_s9] ss:$0 sm:$0xff] }
 0x698   :  { %1106 = vrot.lane.b32.xlu0 %v2013_v10, %s1903_s25  ;;  %v1193_v10 = vld [vmem:[%s2211_s4 + $0x18] sm:$0xff] }
 0x70b   :  { %v1762_v9 = vpop.f32.mrf.mxu1  ;;  %v1101_v11 = vpop.xlane.xlu0 %1100 }
 0x70c   :  { %1861 = vrcp.f32 %v1101_v11 }
 0x70d   :  { %v900_v12 = vpop.f32.mrf.mxu1 }
 0x70e   :  { %1765 = vmatprep.mubr.msk.f32.mxu1 %vm151_vm1, %v900_v12 }
 0x70f   :  { %1766 = vmatmul.mubr.msk.f32.vlgmr.msra.gmra.mxu1 %vm151_vm1, %v1762_v9  ;;  %v1107_v14 = vpop.permute.xlu0 %1106 }
 0x710   :  { %1776 = vmatpush3.msra.mxu1 %v1109_v63  ;;  %1779 = vmatprep.mubr.msk.f32.mxu1 %vm235_vm2, %v1103_v13 }
 0x711   :  { %1777 = vmatprep.subr.mxu1 %v1107_v14 }
 0x712   :  { %1778 = vmatpush3.msra.mxu1 %v1107_v14 }
 0x713   :  { %1782 = vmatprep.subr.mxu1 %v1193_v10 }
 0x719   :  { %v1862_v15 = vpop.eup %1861 }
 0x71a   :  { %v1105_v16 = vmul.f32 %v1862_v15, %v1858_v4  ;;  %v1428_v4 = vld [vmem:[%s2217_s10 + $0x8] sm:$0xff] }
 0x71c   :  { %1780 = vmatmul.mubr.msk.f32.vlgmr.msra.gmra.mxu1 %vm235_vm2, %v1105_v16  ;;  %v1629_v16 = vld [vmem:[%s2218_s11] ss:$0 sm:$0xff] }
 0x71d   :  { %1783 = vmatpush3.msra.mxu1 %v1193_v10 }
 0x71e   :  { %1798 = vmatprep.subr.mxu1 %v1434_v48 }
 0x7cf   :  { %v1767_v18 = vpop.f32.mrf.mxu1 }
 0x7d0   :  { %v992_v20 = vadd.f32 %v1767_v18, %v2097_v26 }
 0x7d1   :  { %v982_v21 = vpop.f32.mrf.mxu1 }
 0x7d2   :  { %v991_v22 = vadd.f32 %v982_v21, %v2099_v28 }
 0x7dc   :  { %v1781_v23 = vpop.f32.mrf.mxu1 }
 0x7de   :  { %v1184_v24 = vpop.f32.mrf.mxu1 }
 0x7df   :  { %1784 = vmatprep.mubr.msk.f32.mxu1 %vm151_vm1, %v1184_v24 }
 0x7e0   :  { %1785 = vmatmul.mubr.msk.f32.vlgmr.msra.gmra.mxu1 %vm151_vm1, %v1781_v23 }
 0x7e1   :  { %1799 = vmatpush3.msra.mxu1 %v1434_v48 }
 0x7e2   :  { %1800 = vmatprep.subr.mxu1 %v1433_v19 }
 0x7e3   :  { %1801 = vmatpush3.msra.mxu1 %v1433_v19 }
 0x7e4   :  { %1802 = vmatprep.subr.mxu1 %v1432_v49 }
 0x7e5   :  { %1803 = vmatpush3.msra.mxu1 %v1432_v49 }
 0x7e6   :  { %1804 = vmatprep.subr.mxu1 %v1431_v50 }
 0x7e7   :  { %1805 = vmatpush3.msra.mxu1 %v1431_v50 }
 0x7e8   :  { %1806 = vmatprep.subr.mxu1 %v1430_v1 }
 0x7e9   :  { %1807 = vmatpush3.msra.mxu1 %v1430_v1 }
 0x7ea   :  { %1808 = vmatprep.subr.mxu1 %v1429_v3 }
 0x7eb   :  { %1809 = vmatpush3.msra.mxu1 %v1429_v3 }
 0x7ec   :  { %1810 = vmatprep.subr.mxu1 %v1428_v4 }
 0x7ed   :  { %1811 = vmatpush3.msra.mxu1 %v1428_v4 }
 0x7ee   :  { %1812 = vmatprep.subr.mxu1 %v1427_v6 }
 0x7ef   :  { %1813 = vmatpush3.msra.mxu1 %v1427_v6 }
 0x8a0   :  { %v1786_v25 = vpop.f32.mrf.mxu1 }
 0x8a1   :  { %v1276_v29 = vadd.f32 %v1786_v25, %v992_v20 }
 0x8a2   :  { %v1266_v30 = vpop.f32.mrf.mxu1 }
 0x8a3   :  { %v1285_v31 = vadd.f32 %v1623_v27, %v1276_v29  ;;  %v1275_v32 = vadd.f32 %v1266_v30, %v991_v22 }
 0x8a5   :  { %v1284_v33 = vadd.f32 %v1623_v27, %v1275_v32  ;;  %v1287_v26 = vadd.f32 %v1285_v31, %v2004_v5 }
 0x8a7   :  { %v1293_v28 = vsel %vm61_vm0, %v1287_v26, 0.0  ;;  %v1286_v34 = vadd.f32 %v1284_v33, %v1991_v2  ;;  %v1336_v2 = vld [vmem:[%s2215_s8 + $0x18] sm:$0xff] }
 0x8a8   :  { %1294 = vadd.xlane.f32.xlu0 %v1293_v28  ;;  %1787 = vmatprep.subr.mxu0 %v1336_v2 }
 0x8a9   :  { %v1290_v35 = vsel %vm61_vm0, %v1286_v34, 0.0  ;;  %1788 = vmatpush3.msra.mxu0 %v1336_v2  ;;  %v1633_v2 = vld [vmem:[%s2220_s13] ss:$0 sm:$0xff] }
 0x8aa   :  { %1291 = vadd.xlane.f32.xlu1 %v1290_v35  ;;  %1789 = vmatprep.subr.mxu0 %v1335_v45 }
 0x8ab   :  { %1790 = vmatpush3.msra.mxu0 %v1335_v45 }
 0x8ac   :  { %1791 = vmatprep.subr.mxu0 %v1334_v46 }
 0x8ad   :  { %1792 = vmatpush3.msra.mxu0 %v1334_v46 }
 0x8ae   :  { %1793 = vmatprep.subr.mxu0 %v1333_v47 }
 0x8af   :  { %1794 = vmatpush3.msra.mxu0 %v1333_v47 }
 0x931   :  { %v1295_v36 = vpop.xlane.xlu0 %1294 }
 0x932   :  { %v1298_v37 = vmul.f32 0.03125, %v1295_v36 }
 0x933   :  { %v1292_v38 = vpop.xlane.xlu1 %1291 }
 0x934   :  { %v1300_v39 = vsub.f32 %v1287_v26, %v1298_v37  ;;  %v1297_v40 = vmul.f32 0.03125, %v1292_v38 }
 0x936   :  { %v1299_v41 = vsub.f32 %v1286_v34, %v1297_v40  ;;  %v1302_v42 = vmul.f32 %v1300_v39, %v1300_v39 }
 0x938   :  { %v1306_v43 = vsel %vm61_vm0, %v1302_v42, 0.0  ;;  %v1301_v44 = vmul.f32 %v1299_v41, %v1299_v41 }
 0x939   :  { %1307 = vadd.xlane.f32.xlu0 %v1306_v43  ;;  %v1632_v43 = vld [vmem:[%s2219_s12] ss:$0 sm:$0xff] }
 0x93a   :  { %v1303_v5 = vsel %vm61_vm0, %v1301_v44, 0.0 }
 0x93b   :  { %1304 = vadd.xlane.f32.xlu1 %v1303_v5 }
 0x9c2   :  { %v1308_v51 = vpop.xlane.xlu0 %1307 }
 0x9c3   :  { %v1310_v52 = vmul.f32 0.03125, %v1308_v51 }
 0x9c4   :  { %v1305_v53 = vpop.xlane.xlu1 %1304 }
 0x9c5   :  { %v1312_v54 = vadd.f32 1e-05, %v1310_v52  ;;  %v1309_v55 = vmul.f32 0.03125, %v1305_v53 }
 0x9c7   :  { %1863 = vrsqrt.f32 %v1312_v54  ;;  %v1311_v56 = vadd.f32 1e-05, %v1309_v55 }
 0x9c9   :  { %1865 = vrsqrt.f32 %v1311_v56 }
 0x9d4   :  { %v1864_v57 = vpop.eup %1863 }
 0x9d5   :  { %v1316_v59 = vmul.f32 %v1864_v57, %v1300_v39 }
 0x9d6   :  { %v1866_v17 = vpop.eup %1865 }
 0x9d7   :  { %v1315_v60 = vmul.f32 %v1866_v17, %v1299_v41  ;;  %v1324_v61 = vmul.f32 %v1624_v58, %v1316_v59 }
 0x9d9   :  { %v1323_v8 = vmul.f32 %v1624_v58, %v1315_v60  ;;  %v1332_v0 = vadd.f32 %v1625_v62, %v1324_v61 }
 0x9db   :  { %v1331_v63 = vadd.f32 %v1625_v62, %v1323_v8 }
 0x9dd   :  { %1795 = vmatprep.mubr.msk.f32.mxu0 %vm61_vm0, %v1331_v63 }
 0x9de   :  { %1796 = vmatmul.mubr.msk.f32.vlgmr.msra.gmra.mxu0 %vm61_vm0, %v1332_v0 }
 0xa9e   :  { %v1797_v9 = vpop.f32.mrf.mxu0 }
 0xa9f   :  { %v1422_v11 = vadd.f32 %v1797_v9, %v1626_v7 }
 0xaa0   :  { %v1416_v12 = vpop.f32.mrf.mxu0 }
 0xaa1   :  { %v1417_v13 = vadd.f32 %v1626_v7, %v1416_v12  ;;  %v1426_v15 = vmax.f32 %v1422_v11, 0.0 }
 0xaa3   :  { %v1425_v14 = vmax.f32 %v1417_v13, 0.0 }
 0xaa5   :  { %1814 = vmatprep.mubr.msk.f32.mxu1 %vm1442_vm3, %v1425_v14 }
 0xaa6   :  { %1815 = vmatmul.mubr.msk.f32.vlgmr.msra.gmra.mxu1 %vm1442_vm3, %v1426_v15 }
 0xb66   :  { %v1816_v10 = vpop.f32.mrf.mxu1 }
 0xb67   :  { %v1521_v18 = vadd.f32 %v1816_v10, %v1629_v16 }
 0xb68   :  { %v1515_v20 = vpop.f32.mrf.mxu1 }
 0xb69   :  { %v1516_v21 = vadd.f32 %v1629_v16, %v1515_v20  ;;  %v1525_v22 = vadd.f32 %v1521_v18, %v1332_v0 }
 0xb6b   :  { %v1531_v23 = vsel %vm61_vm0, %v1525_v22, 0.0  ;;  %v1524_v24 = vadd.f32 %v1516_v21, %v1331_v63 }
 0xb6c   :  { %1532 = vadd.xlane.f32.xlu0 %v1531_v23 }
 0xb6d   :  { %v1528_v25 = vsel %vm61_vm0, %v1524_v24, 0.0 }
 0xb6e   :  { %1529 = vadd.xlane.f32.xlu1 %v1528_v25 }
 0xbf5   :  { %v1533_v27 = vpop.xlane.xlu0 %1532 }
 0xbf6   :  { %v1535_v29 = vmul.f32 0.03125, %v1533_v27 }
 0xbf7   :  { %v1530_v30 = vpop.xlane.xlu1 %1529 }
 0xbf8   :  { %v1537_v31 = vsub.f32 %v1525_v22, %v1535_v29  ;;  %v1534_v32 = vmul.f32 0.03125, %v1530_v30 }
 0xbfa   :  { %v1536_v33 = vsub.f32 %v1524_v24, %v1534_v32  ;;  %v1539_v26 = vmul.f32 %v1537_v31, %v1537_v31 }
 0xbfc   :  { %v1543_v28 = vsel %vm61_vm0, %v1539_v26, 0.0  ;;  %v1538_v34 = vmul.f32 %v1536_v33, %v1536_v33 }
 0xbfd   :  { %1544 = vadd.xlane.f32.xlu0 %v1543_v28 }
 0xbfe   :  { %v1540_v35 = vsel %vm61_vm0, %v1538_v34, 0.0 }
 0xbff   :  { %1541 = vadd.xlane.f32.xlu1 %v1540_v35 }
 0xc86   :  { %v1545_v36 = vpop.xlane.xlu0 %1544 }
 0xc87   :  { %v1547_v37 = vmul.f32 0.03125, %v1545_v36 }
 0xc88   :  { %v1542_v38 = vpop.xlane.xlu1 %1541 }
 0xc89   :  { %v1549_v39 = vadd.f32 1e-05, %v1547_v37  ;;  %v1546_v40 = vmul.f32 0.03125, %v1542_v38 }
 0xc8b   :  { %1867 = vrsqrt.f32 %v1549_v39  ;;  %v1548_v41 = vadd.f32 1e-05, %v1546_v40 }
 0xc8d   :  { %1869 = vrsqrt.f32 %v1548_v41 }
 0xc98   :  { %v1868_v42 = vpop.eup %1867 }
 0xc99   :  { %v1553_v44 = vmul.f32 %v1868_v42, %v1537_v31 }
 0xc9a   :  { %v1870_v5 = vpop.eup %1869 }
 0xc9b   :  { %v1552_v45 = vmul.f32 %v1870_v5, %v1536_v33  ;;  %v1561_v46 = vmul.f32 %v1632_v43, %v1553_v44 }
 0xc9d   :  { %v1560_v47 = vmul.f32 %v1632_v43, %v1552_v45  ;;  %v1569_v48 = vadd.f32 %v1633_v2, %v1561_v46 }
 0xc9f   :  { %v1568_v19 = vadd.f32 %v1633_v2, %v1560_v47  ;;  %1571 = vst.msk [vmem:[#allocation2 + $0x8] sm:$0xff] %vm61_vm0, %v1569_v48 }
 0xca1   :  { %1570 = vst.msk [vmem:[#allocation2] sm:$0xff] %vm61_vm0, %v1568_v19 }
 0xca2   :  { %1882 = shalt.err (!%p1879_p4)
}
 0xca3   :  { %s1905_s12 = smov 128   ;;  %s1906_s13 = smov 8  }
 0xca4   :  { %1583 = dma.vmem_to_hbm [thread:$0]  %s1578_s19, 256, %s2221_s14, [#allocation3], %s1905_s12, %s1905_s12, %s1906_s13  }
 0xca5   :  { %1891 = dma.done.wait [#allocation3], 256  }
 0xca6   :  { %1892 = vsyncadd [#allocation3], 4294967040 }
 0xca7   :  { %1587 = vsyncpa [#allocation3], 1 }

</bundles_post_ra>
